<compile_context>
chip_gen: v5e
topology: v5e:2x2
jax: 0.10.0
libtpu: 0.0.40
codegen_flags: <defaults>
</compile_context>

<pallas_src>
import math
import jax
import jax.numpy as jnp
from jax.experimental import pallas as pl
from jax.experimental.pallas import tpu as pltpu


def _attention_kernel(inp_ref, enc_ref, wht_ref, wet_ref, b_ref, v_ref, out_ref):
    # inp_ref: (TB, H)     enc_ref: (TB, L, H)
    # wht_ref: (H, H)      wet_ref: (H, H)
    # b_ref:   (1, H)      v_ref:   (1, H)
    # out_ref: (TB, H)
    tb, seq, hdim = enc_ref.shape

    h = inp_ref[...]                                     # (TB, H)
    enc3 = enc_ref[...]                                  # (TB, L, H)

    # Hidden-state projection, batched over the whole block: one MXU pass.
    h_proj = (
        jnp.dot(h, wht_ref[...], preferred_element_type=jnp.float32) + b_ref[...]
    )                                                    # (TB, H)

    # Encoder projection: fold (TB, L) into a single large MXU M dimension.
    enc2 = enc3.reshape(tb * seq, hdim)                  # (TB*L, H)
    e_proj = jnp.dot(enc2, wet_ref[...], preferred_element_type=jnp.float32)
    e_proj = e_proj.reshape(tb, seq, hdim)               # (TB, L, H)

    # energy = tanh(W_h h + W_e e + b)
    energy = jnp.tanh(e_proj + h_proj[:, None, :])       # (TB, L, H)

    # score = v . energy  -> broadcast-mul + lane reduce (no N=1 matmul)
    scores = jnp.sum(energy * v_ref[...][None, :, :], axis=-1)   # (TB, L)

    # softmax over the sequence axis (numerically stable, matches F.softmax dim=1)
    m = jnp.max(scores, axis=1, keepdims=True)           # (TB, 1)
    p = jnp.exp(scores - m)                              # (TB, L)
    denom = jnp.sum(p, axis=1, keepdims=True)            # (TB, 1)
    attn = p * pl.reciprocal(denom, approx=True)         # (TB, L)

    # weighted sum of encoder outputs: sum_l attn[b,l] * enc[b,l,:]
    out = jnp.sum(attn[:, :, None] * enc3, axis=1)       # (TB, H)
    out_ref[...] = out.astype(out_ref.dtype)


def _pick_tb(batch, seq, hidden, tile_budget_bytes=6 << 20):
    """Pick the batch tile TB.

    Whole batch if its encoder tile fits the budget (single grid step),
    otherwise the largest multiple of 8 dividing B that fits (multiples of 8
    keep the sublane dim of the (TB, H) input/output blocks aligned).  The
    budget is small enough that double-buffered tiles + weights stay well
    under the default scoped-VMEM limit on v5e/v6e/v7x.
    """
    bytes_per_batch_row = seq * hidden * 4
    if batch * bytes_per_batch_row <= tile_budget_bytes:
        return batch
    best = None
    cand = 8
    while cand <= batch:
        if batch % cand == 0 and cand * bytes_per_batch_row <= tile_budget_bytes:
            best = cand
        cand += 8
    if best is not None:
        return best
    return 8 if batch % 8 == 0 else batch


def attention_custom_forward(inputs, encoder_out, params):
    """inputs: (B, H) f32; encoder_out: (L, B, H) f32.  Returns (B, 1, H)."""
    L, B, H = encoder_out.shape
    # Batch-major encoder view.  (For tiny H rows the one-off transpose is
    # cheaper than strided per-row DMA; see TODO above for the large-H path.)
    enc_bm = jnp.transpose(encoder_out, (1, 0, 2))       # (B, L, H)

    W = params["attn_w"]          # (H, 2H)  (PyTorch Linear weight layout)
    b = params["attn_b"]          # (H,)
    v = params["v"]               # (H,)

    w_h_t = W[:, :H].T            # (H, H): applied to the repeated hidden state
    w_e_t = W[:, H:].T            # (H, H): applied to encoder outputs
    b2 = b.reshape(1, H)
    v2 = v.reshape(1, H)

    tb = _pick_tb(B, L, H)
    grid = (B // tb,)

    grid_spec = pltpu.PrefetchScalarGridSpec(
        num_scalar_prefetch=0,
        grid=grid,
        in_specs=[
            pl.BlockSpec((tb, H), lambda i: (i, 0)),        # inputs (batch block)
            pl.BlockSpec((tb, L, H), lambda i: (i, 0, 0)),  # encoder (batch block)
            pl.BlockSpec((H, H), lambda i: (0, 0)),         # W_h^T (resident)
            pl.BlockSpec((H, H), lambda i: (0, 0)),         # W_e^T (resident)
            pl.BlockSpec((1, H), lambda i: (0, 0)),         # bias  (resident)
            pl.BlockSpec((1, H), lambda i: (0, 0)),         # v     (resident)
        ],
        out_specs=pl.BlockSpec((tb, H), lambda i: (i, 0)),  # lane/sublane-dense
    )

    out2d = pl.pallas_call(
        _attention_kernel,
        out_shape=jax.ShapeDtypeStruct((B, H), jnp.float32),
        grid_spec=grid_spec,
        compiler_params=pltpu.CompilerParams(
            dimension_semantics=("parallel",)),  # shards batch blocks across TCs on v7x
    )(inputs, enc_bm, w_h_t, w_e_t, b2, v2)

    return out2d[:, None, :]      # (B, 1, H) to match the PyTorch module


def _reference_forward(inputs, encoder_out, params):
    """Pure-JAX reference mirroring the PyTorch module (bpe=False)."""
    L, B, H = encoder_out.shape
    enc = jnp.transpose(encoder_out, (1, 0, 2))                 # (B, L, H)
    h_rep = jnp.broadcast_to(inputs[:, None, :], (B, L, H))     # (B, L, H)
    cat = jnp.concatenate([h_rep, enc], axis=2)                 # (B, L, 2H)
    energy = jnp.tanh(cat @ params["attn_w"].T + params["attn_b"])  # (B, L, H)
    scores = jnp.einsum("blh,h->bl", energy, params["v"])       # (B, L)
    attn = jax.nn.softmax(scores, axis=1)[:, None, :]           # (B, 1, L)
    return attn @ enc                                           # (B, 1, H)


def make_params(hidden_size, key):
    """Deterministic synthetic params matching nn.Linear(2H, H) + v (H,)."""
    k1, k2, k3 = jax.random.split(key, 3)
    bound = 1.0 / math.sqrt(2 * hidden_size)
    attn_w = jax.random.uniform(k1, (hidden_size, 2 * hidden_size),
                                minval=-bound, maxval=bound, dtype=jnp.float32)
    attn_b = jax.random.uniform(k2, (hidden_size,),
                                minval=-bound, maxval=bound, dtype=jnp.float32)
    stdv = 1.0 / math.sqrt(hidden_size)
    v = stdv * jax.random.normal(k3, (hidden_size,), dtype=jnp.float32)
    return {"attn_w": attn_w, "attn_b": attn_b, "v": v}


if __name__ == "__main__":
    B, L, H = 2, 8, 32
    key = jax.random.PRNGKey(0)
    kp, ki, ke = jax.random.split(key, 3)

    params = make_params(H, kp)
    inputs = jax.random.normal(ki, (B, H), dtype=jnp.float32)          # decoder hidden
    encoder_out = jax.random.normal(ke, (L, B, H), dtype=jnp.float32)  # (L, B, H)

    out = attention_custom_forward(inputs, encoder_out, params)
    out = jax.block_until_ready(out)

    ref = _reference_forward(inputs, encoder_out, params)
    assert out.shape == (B, 1, H)
    # Tolerance accommodates the EUP approximate reciprocal (rel err ~1e-4)
    # used for the softmax normalization; everything else is exact f32.
    assert jnp.allclose(out, ref, atol=2e-3, rtol=2e-3)

    print("KERNEL_OK")
</pallas_src>

<mosaic_0001>
module attributes {stable_mosaic.version = 11 : i64} {
  func.func @_attention_kernel(%arg0: i32, %arg1: memref<2x32xf32, #tpu.memory_space<vmem>>, %arg2: memref<2x8x32xf32, #tpu.memory_space<vmem>>, %arg3: memref<32x32xf32, #tpu.memory_space<vmem>>, %arg4: memref<32x32xf32, #tpu.memory_space<vmem>>, %arg5: memref<1x32xf32, #tpu.memory_space<vmem>>, %arg6: memref<1x32xf32, #tpu.memory_space<vmem>>, %arg7: memref<2x32xf32, #tpu.memory_space<vmem>>) attributes {dimension_semantics = [#tpu.dimension_semantics<parallel>], iteration_bounds = array<i64: 1>, scalar_prefetch = 0 : i64, scratch_operands = 0 : i64, tpu.core_type = #tpu.core_type<tc>, window_params = [{transform_indices = @transform_0, window_bounds = array<i64: 2, 32>}, {transform_indices = @transform_1, window_bounds = array<i64: 2, 8, 32>}, {pipeline_mode = #tpu.pipeline_mode<synchronous>, transform_indices = @transform_2, window_bounds = array<i64: 32, 32>}, {pipeline_mode = #tpu.pipeline_mode<synchronous>, transform_indices = @transform_3, window_bounds = array<i64: 32, 32>}, {pipeline_mode = #tpu.pipeline_mode<synchronous>, transform_indices = @transform_4, window_bounds = array<i64: 1, 32>}, {pipeline_mode = #tpu.pipeline_mode<synchronous>, transform_indices = @transform_5, window_bounds = array<i64: 1, 32>}, {transform_indices = @transform_6, window_bounds = array<i64: 2, 32>}]} {
    %c0 = arith.constant 0 : index
    %c0_0 = arith.constant 0 : index
    %0 = vector.load %arg1[%c0, %c0_0] : memref<2x32xf32, #tpu.memory_space<vmem>>, vector<2x32xf32>
    %c0_1 = arith.constant 0 : index
    %c0_2 = arith.constant 0 : index
    %c0_3 = arith.constant 0 : index
    %1 = vector.load %arg2[%c0_1, %c0_2, %c0_3] : memref<2x8x32xf32, #tpu.memory_space<vmem>>, vector<2x8x32xf32>
    %c0_4 = arith.constant 0 : index
    %c0_5 = arith.constant 0 : index
    %2 = vector.load %arg3[%c0_4, %c0_5] : memref<32x32xf32, #tpu.memory_space<vmem>>, vector<32x32xf32>
    %cst = arith.constant dense<0.000000e+00> : vector<2x32xf32>
    %3 = tpu.matmul %0, %2, %cst {dimension_numbers = #tpu.dot_dimension_numbers<[1], [0], [0], [1], [0, 0, 1, 1], [], []>} : vector<2x32xf32>, vector<32x32xf32>, vector<2x32xf32> -> vector<2x32xf32>
    %c0_6 = arith.constant 0 : index
    %c0_7 = arith.constant 0 : index
    %4 = vector.load %arg5[%c0_6, %c0_7] : memref<1x32xf32, #tpu.memory_space<vmem>>, vector<1x32xf32>
    %5 = vector.broadcast %4 : vector<1x32xf32> to vector<2x32xf32>
    %6 = arith.addf %3, %5 : vector<2x32xf32>
    %7 = vector.shape_cast %1 : vector<2x8x32xf32> to vector<16x32xf32>
    %c0_8 = arith.constant 0 : index
    %c0_9 = arith.constant 0 : index
    %8 = vector.load %arg4[%c0_8, %c0_9] : memref<32x32xf32, #tpu.memory_space<vmem>>, vector<32x32xf32>
    %cst_10 = arith.constant dense<0.000000e+00> : vector<16x32xf32>
    %9 = tpu.matmul %7, %8, %cst_10 {dimension_numbers = #tpu.dot_dimension_numbers<[1], [0], [0], [1], [0, 0, 1, 1], [], []>} : vector<16x32xf32>, vector<32x32xf32>, vector<16x32xf32> -> vector<16x32xf32>
    %10 = vector.shape_cast %9 : vector<16x32xf32> to vector<2x8x32xf32>
    %11 = vector.shape_cast %6 : vector<2x32xf32> to vector<2x1x32xf32>
    %12 = vector.broadcast %11 : vector<2x1x32xf32> to vector<2x8x32xf32>
    %13 = arith.addf %10, %12 : vector<2x8x32xf32>
    %14 = math.tanh %13 : vector<2x8x32xf32>
    %c0_11 = arith.constant 0 : index
    %c0_12 = arith.constant 0 : index
    %15 = vector.load %arg6[%c0_11, %c0_12] : memref<1x32xf32, #tpu.memory_space<vmem>>, vector<1x32xf32>
    %16 = vector.shape_cast %15 : vector<1x32xf32> to vector<1x1x32xf32>
    %17 = vector.broadcast %16 : vector<1x1x32xf32> to vector<2x8x32xf32>
    %18 = arith.mulf %14, %17 : vector<2x8x32xf32>
    %cst_13 = arith.constant dense<0.000000e+00> : vector<2x8xf32>
    %19 = vector.multi_reduction <add>, %18, %cst_13 [2] : vector<2x8x32xf32> to vector<2x8xf32>
    %cst_14 = arith.constant dense<0xFF800000> : vector<2xf32>
    %20 = vector.multi_reduction <maximumf>, %19, %cst_14 [1] : vector<2x8xf32> to vector<2xf32>
    %21 = vector.shape_cast %20 : vector<2xf32> to vector<2x1xf32>
    %22 = vector.broadcast %21 : vector<2x1xf32> to vector<2x8xf32>
    %23 = arith.subf %19, %22 : vector<2x8xf32>
    %24 = math.exp %23 : vector<2x8xf32>
    %cst_15 = arith.constant dense<0.000000e+00> : vector<2xf32>
    %25 = vector.multi_reduction <add>, %24, %cst_15 [1] : vector<2x8xf32> to vector<2xf32>
    %26 = vector.shape_cast %25 : vector<2xf32> to vector<2x1xf32>
    %27 = tpu.reciprocal %26 {approx = true} : vector<2x1xf32> -> vector<2x1xf32>
    %28 = vector.broadcast %27 : vector<2x1xf32> to vector<2x8xf32>
    %29 = arith.mulf %24, %28 : vector<2x8xf32>
    %30 = vector.shape_cast %29 : vector<2x8xf32> to vector<2x8x1xf32>
    %31 = vector.broadcast %30 : vector<2x8x1xf32> to vector<2x8x32xf32>
    %32 = arith.mulf %31, %1 : vector<2x8x32xf32>
    %cst_16 = arith.constant dense<0.000000e+00> : vector<2x32xf32>
    %33 = vector.multi_reduction <add>, %32, %cst_16 [1] : vector<2x8x32xf32> to vector<2x32xf32>
    %c0_17 = arith.constant 0 : index
    %c0_18 = arith.constant 0 : index
    %34 = vector.load %arg7[%c0_17, %c0_18] : memref<2x32xf32, #tpu.memory_space<vmem>>, vector<2x32xf32>
    tpu.vector_store %arg7[%c0_17, %c0_18], %33 {strides = array<i32>} : memref<2x32xf32, #tpu.memory_space<vmem>>, vector<2x32xf32>,
    return
  }
  func.func @transform_0(%arg0: i32) -> (i32, i32) {
    %c0_i32 = arith.constant 0 : i32
    %c0_i32_0 = arith.constant 0 : i32
    return %arg0, %c0_i32 : i32, i32
  }
  func.func @transform_1(%arg0: i32) -> (i32, i32, i32) {
    %c0_i32 = arith.constant 0 : i32
    %c0_i32_0 = arith.constant 0 : i32
    %c0_i32_1 = arith.constant 0 : i32
    return %arg0, %c0_i32, %c0_i32_0 : i32, i32, i32
  }
  func.func @transform_2(%arg0: i32) -> (i32, i32) {
    %c0_i32 = arith.constant 0 : i32
    %c0_i32_0 = arith.constant 0 : i32
    %c0_i32_1 = arith.constant 0 : i32
    return %c0_i32, %c0_i32_0 : i32, i32
  }
  func.func @transform_3(%arg0: i32) -> (i32, i32) {
    %c0_i32 = arith.constant 0 : i32
    %c0_i32_0 = arith.constant 0 : i32
    %c0_i32_1 = arith.constant 0 : i32
    return %c0_i32, %c0_i32_0 : i32, i32
  }
  func.func @transform_4(%arg0: i32) -> (i32, i32) {
    %c0_i32 = arith.constant 0 : i32
    %c0_i32_0 = arith.constant 0 : i32
    %c0_i32_1 = arith.constant 0 : i32
    return %c0_i32, %c0_i32_0 : i32, i32
  }
  func.func @transform_5(%arg0: i32) -> (i32, i32) {
    %c0_i32 = arith.constant 0 : i32
    %c0_i32_0 = arith.constant 0 : i32
    %c0_i32_1 = arith.constant 0 : i32
    return %c0_i32, %c0_i32_0 : i32, i32
  }
  func.func @transform_6(%arg0: i32) -> (i32, i32) {
    %c0_i32 = arith.constant 0 : i32
    %c0_i32_0 = arith.constant 0 : i32
    return %arg0, %c0_i32 : i32, i32
  }
}

</mosaic_0001>

<bundles_post_ra>
// kernel: tpu_custom_call.1
= control target key start
LH: loop header
LB: loop body
LE: loop exit
PB: predicated region body
PF: predicated region fallthrough
CT: control target
= control target key end

     0   :  { %11 = vsyncpa [#allocation3], 0  ;;  %s515_s0 = inlined_call_operand.hbm [shape: f32[2,32], index: 0, kind: input, shape index: {}]   ;;  %s516_s1 = inlined_call_operand.hbm [shape: f32[2,8,32], index: 1, kind: input, shape index: {}]   ;;  %s517_s2 = inlined_call_operand.hbm [shape: f32[32,32], index: 2, kind: input, shape index: {}]   ;;  %s518_s3 = inlined_call_operand.hbm [shape: f32[32,32], index: 3, kind: input, shape index: {}]   ;;  %s519_s4 = inlined_call_operand.vmem [shape: f32[1,32], index: 4, kind: input, shape index: {}]   ;;  %s520_s5 = inlined_call_operand.vmem [shape: f32[1,32], index: 5, kind: input, shape index: {}]   ;;  %s521_s6 = inlined_call_operand.hbm [shape: f32[2,32], index: 6, kind: output, shape index: {}]  }
   0x1   :  { %12 = vsyncpa [#allocation6], 0 }
   0x2   :  { %13 = vsyncpa [#allocation9], 0  ;;  %s30_s23 = sshll.u32 %s516_s1, 4  ;;  %s31_s23 = int_to_ptr.hbm [resolvable:$true] %s30_s23 }
   0x3   :  { %14 = vsyncpa [#allocation4], 0  ;;  %s431_s24 = smov [#allocation5]   ;;  %s20_s28 = sshll.u32 %s515_s0, 4  ;;  %s21_s28 = int_to_ptr.hbm [resolvable:$true] %s20_s28 }
   0x4   :  { %s32_s25 = sshll.u32 %s431_s24, 4  ;;  %s432_s29 = smov 128   ;;  %s33_s25 = int_to_ptr.vmem [resolvable:$true] %s32_s25 }
   0x5   :  { %s433_s30 = smov 8   ;;  %s434_s7 = smov [#allocation2]  }
   0x6   :  { %38 = dma.hbm_to_vmem [thread:$0]  %s31_s23, 256, %s33_s25, [#allocation6], %s432_s29, %s432_s29, %s433_s30  }
   0x7   :  { %s22_s8 = sshll.u32 %s434_s7, 4  ;;  %s43_s11 = sshll.u32 %s517_s2, 4  ;;  %s23_s8 = int_to_ptr.vmem [resolvable:$true] %s22_s8  ;;  %s44_s11 = int_to_ptr.hbm [resolvable:$true] %s43_s11 }
   0x8   :  { %25 = dma.hbm_to_vmem [thread:$0]  %s21_s28, 32, %s23_s8, [#allocation3]  }
   0x9   :  { %s56_s13 = sshll.u32 %s518_s3, 4  ;;  %s435_s14 = smov [#allocation7]   ;;  %s57_s13 = int_to_ptr.hbm [resolvable:$true] %s56_s13 }
   0xa   :  { %s45_s15 = sshll.u32 %s435_s14, 4  ;;  %s436_s0 = smov [#allocation8]   ;;  %s46_s15 = int_to_ptr.vmem [resolvable:$true] %s45_s15 }
   0xb   :  { %51 = dma.hbm_to_vmem [thread:$0]  %s44_s11, 512, %s46_s15, [#allocation6], %s432_s29, %s432_s29, %s433_s30  }
   0xc   :  { %s58_s16 = sshll.u32 %s436_s0, 4  ;;  %s59_s16 = int_to_ptr.vmem [resolvable:$true] %s58_s16 }
   0xd   :  { %64 = dma.hbm_to_vmem [thread:$0]  %s57_s13, 512, %s59_s16, [#allocation9], %s432_s29, %s432_s29, %s433_s30  }
   0xe   :  { %423 = dma.done.wait [#allocation3], 32  }
   0xf   :  { %424 = vsyncadd [#allocation3], 4294967264 }
  0x10   :  { %425 = dma.done.wait [#allocation6], 768  }
  0x11   :  { %426 = vsyncadd [#allocation6], 4294966528 }
  0x12   :  { %427 = dma.done.wait [#allocation9], 512  }
  0x13   :  { %428 = vsyncadd [#allocation9], 4294966784  ;;  %v91_v0 = vld [vmem:[#allocation7 + $0x18] sm:$0xff]  ;;  %v90_v2 = vld [vmem:[#allocation7 + $0x10] sm:$0xff]  ;;  %vm96_vm0 = vcmask 261120   ;;  %v177_v29 = vlaneseq  ;;  %vm181_vm1 = vcmask 1041409  }
  0x14   :  { %v123_v1 = vld [vmem:[#allocation8 + $0x18] sm:$0xff]  ;;  %112 = vmatpush.msra.mxu0 %v91_v0  ;;  %v122_v3 = vld [vmem:[#allocation8 + $0x10] sm:$0xff]  ;;  %v89_v4 = vld [vmem:[#allocation7 + $0x8] sm:$0xff]  ;;  %vm184_vm2 = vcmask 58368   ;;  %v437_v36 = vmov 0   ;;  %s261_s21 = sshll.u32 %s521_s6, 4  ;;  %s262_s21 = int_to_ptr.hbm [resolvable:$true] %s261_s21 }
  0x15   :  { %276 = vmatpush.msra.mxu2 %v123_v1  ;;  %142 = vmatpush.msra.mxu1 %v123_v1  ;;  %v121_v5 = vld [vmem:[#allocation8 + $0x8] sm:$0xff]  ;;  %v88_v6 = vld [vmem:[#allocation7] sm:$0xff]  ;;  %v486_v9 = vld [vmem:[#allocation5 + $0x8] sm:$0xff]  ;;  %v178_v30 = vand.u32 127, %v177_v29  ;;  %vm252_vm3 = vcmask 254976  }
  0x16   :  { %113 = vmatpush.msra.mxu0 %v90_v2  ;;  %v120_v7 = vld [vmem:[#allocation8] sm:$0xff]  ;;  %v85_v8 = vld [vmem:[#allocation2] sm:$0x3]  ;;  %v488_v10 = vld [vmem:[#allocation5] sm:$0xff]  ;;  %289 = vset.pattern.permute.xlu2 %v437_v36 }
  0x17   :  { %277 = vmatpush.msra.mxu2 %v122_v3  ;;  %143 = vmatpush.msra.mxu1 %v122_v3  ;;  %v291_v11 = vld [vmem:[%s519_s4] ss:$0 sm:$0xff]  ;;  %s438_s4 = smov [#allocation10]  }
  0x18   :  { %114 = vmatpush.msra.mxu0 %v89_v4  ;;  %v292_v21 = vld [vmem:[%s520_s5] ss:$0 sm:$0xff]  ;;  %288 = vset.pattern.permute.xlu1 %v437_v36  ;;  %s259_s5 = sshll.u32 %s438_s4, 4  ;;  %s260_s5 = int_to_ptr.vmem [resolvable:$true] %s259_s5 }
  0x19   :  { %278 = vmatpush.msra.mxu2 %v121_v5  ;;  %144 = vmatpush.msra.mxu1 %v121_v5 }
  0x1a   :  { %115 = vmatpush.msra.mxu0 %v88_v6  ;;  %290 = vset.pattern.permute.xlu0 %v437_v36 }
  0x1b   :  { %279 = vmatpush.msra.mxu2 %v120_v7  ;;  %273 = vmatmul.msk.f32.vlgmr.msra.gmra.mxu0 %vm96_vm0, %v85_v8 }
  0x1c   :  { %275 = vmatmul.msk.f32.vlgmr.msra.gmra.mxu2 %vm96_vm0, %v486_v9  ;;  %145 = vmatpush.msra.mxu1 %v120_v7 }
  0x1d   :  { %274 = vmatmul.msk.f32.vlgmr.msra.gmra.mxu1 %vm96_vm0, %v488_v10 }
  0x98   :  { %v117_v12 = vpop.f32.mrf.mxu0 }
  0x99   :  { %v118_v13 = vadd.f32 %v291_v11, %v117_v12 }
  0x9a   :  { %v147_v14 = vpop.f32.mrf.mxu1 }
  0x9b   :  { %v154_v15 = vrot.slane %v118_v13, 1  ;;  %v155_v16 = vperm.slane %v118_v13, 0 }
  0x9d   :  { %v159_v17 = vadd.f32 %v155_v16, %v147_v14  ;;  %v156_v18 = vperm.slane %v154_v15, 0 }
  0x9f   :  { %v150_v19 = vpop.f32.mrf.mxu2  ;;  %293 = vtanh.f32 %v159_v17 }
  0xa0   :  { %v160_v20 = vadd.f32 %v156_v18, %v150_v19 }
  0xa2   :  { %295 = vtanh.f32 %v160_v20 }
  0xa5   :  { %v294_v22 = vpop.eup %293 }
  0xa6   :  { %v167_v23 = vmul.f32 %v294_v22, %v292_v21 }
  0xa8   :  { %v169_v24 = vsel %vm96_vm0, %v167_v23, 0.0  ;;  %v296_v25 = vpop.eup %295 }
  0xa9   :  { %170 = vadd.xlane.f32.xlu0 %v169_v24  ;;  %v168_v26 = vmul.f32 %v296_v25, %v292_v21 }
  0xab   :  { %v172_v27 = vsel %vm96_vm0, %v168_v26, 0.0 }
  0xb1   :  { %173 = vadd.xlane.f32.xlu0 %v172_v27 }
 0x11c   :  { %v171_v28 = vpop.xlane.xlu0 %170 }
 0x11d   :  { %v179_v32 = vperm.slane %v171_v28, %v178_v30 }
 0x124   :  { %v174_v31 = vpop.xlane.xlu0 %173 }
 0x125   :  { %v180_v33 = vperm.slane %v174_v31, %v178_v30 }
 0x127   :  { %v182_v34 = vsel %vm181_vm1, %v180_v33, %v179_v32 }
 0x128   :  { %v185_v35 = vsel %vm184_vm2, %v182_v34, -inf }
 0x129   :  { %186 = vmax.xlane.f32.xlu1 %v185_v35 }
 0x19c   :  { %v187_v37 = vpop.xlane.xlu1 %186 }
 0x19d   :  { %v189_v38 = vperm.slane %v187_v37, 0  ;;  %v190_v39 = vperm.slane %v187_v37, 1 }
 0x19f   :  { %v193_v40 = vsub.f32 %v171_v28, %v189_v38  ;;  %v194_v41 = vsub.f32 %v174_v31, %v190_v39 }
 0x1a1   :  { %v195_v42 = vmul.f32 1.442695, %v193_v40  ;;  %v197_v43 = vmul.f32 1.442695, %v194_v41 }
 0x1a3   :  { %297 = vpow2.f32 %v195_v42 }
 0x1a4   :  { %299 = vpow2.f32 %v197_v43 }
 0x1a9   :  { %v298_v44 = vpop.eup %297 }
 0x1aa   :  { %v300_v45 = vpop.eup %299  ;;  %202 = vperm.xlu1 %288, %v298_v44  }
 0x1ab   :  { %205 = vperm.xlu2 %289, %v300_v45  }
 0x205   :  { %v206_v46 = vpop.permute.xlu2 %205 }
 0x206   :  { %v208_v48 = vperm.slane %v206_v46, %v178_v30 }
 0x21c   :  { %v203_v47 = vpop.permute.xlu1 %202 }
 0x21d   :  { %v207_v49 = vperm.slane %v203_v47, %v178_v30 }
 0x21f   :  { %v209_v50 = vsel %vm181_vm1, %v208_v48, %v207_v49 }
 0x220   :  { %v211_v51 = vsel %vm184_vm2, %v209_v50, 0.0 }
 0x221   :  { %212 = vadd.xlane.f32.xlu2 %v211_v51 }
 0x294   :  { %v213_v52 = vpop.xlane.xlu2 %212 }
 0x295   :  { %301 = vrcp.f32 %v213_v52 }
 0x29b   :  { %v302_v53 = vpop.eup %301 }
 0x29c   :  { %v217_v54 = vperm.slane %v302_v53, 1  ;;  %v216_v55 = vperm.slane %v302_v53, 0 }
 0x29e   :  { %v221_v56 = vmul.f32 %v300_v45, %v217_v54  ;;  %v220_v57 = vmul.f32 %v298_v44, %v216_v55 }
 0x2a0   :  { %229 = vperm.xlu1 %288, %v221_v56   ;;  %224 = vperm.xlu0 %290, %v220_v57  }
 0x312   :  { %v230_v58 = vpop.permute.xlu1 %229  ;;  %v225_v59 = vpop.permute.xlu0 %224 }
 0x313   :  { %v233_v60 = vmul.f32 %v230_v58, %v486_v9  ;;  %v232_v61 = vmul.f32 %v225_v59, %v488_v10 }
 0x315   :  { %v241_v62 = vsel %vm96_vm0, %v233_v60, 0.0  ;;  %v234_v63 = vsel %vm96_vm0, %v232_v61, 0.0 }
 0x316   :  { %v242_v0 = vrot.slane %v241_v62, 4  ;;  %v235_v1 = vrot.slane %v234_v63, 4 }
 0x318   :  { %v243_v2 = vadd.f32 %v242_v0, %v241_v62  ;;  %v236_v3 = vadd.f32 %v235_v1, %v234_v63 }
 0x31a   :  { %v244_v4 = vrot.slane %v243_v2, 2  ;;  %v237_v5 = vrot.slane %v236_v3, 2 }
 0x31c   :  { %v245_v6 = vadd.f32 %v244_v4, %v243_v2  ;;  %v238_v7 = vadd.f32 %v237_v5, %v236_v3 }
 0x31e   :  { %v246_v8 = vrot.slane %v245_v6, 1  ;;  %v239_v11 = vrot.slane %v238_v7, 1 }
 0x320   :  { %v247_v9 = vadd.f32 %v246_v8, %v245_v6  ;;  %v240_v10 = vadd.f32 %v239_v11, %v238_v7 }
 0x322   :  { %v250_v12 = vsel %vm181_vm1, %v247_v9, %v240_v10 }
 0x323   :  { %253 = vst.msk [vmem:[#allocation10] sm:$0x3] %vm252_vm3, %v250_v12 }
 0x324   :  { %264 = dma.vmem_to_hbm [thread:$0]  %s260_s5, 32, %s262_s21, [#allocation4]  }
 0x325   :  { %429 = dma.done.wait [#allocation4], 32  }
 0x326   :  { %430 = vsyncadd [#allocation4], 4294967264 }
 0x327   :  { %269 = vsyncpa [#allocation3], 1 }
 0x328   :  { %270 = vsyncpa [#allocation6], 1 }
 0x329   :  { %271 = vsyncpa [#allocation9], 1 }
 0x32a   :  { %272 = vsyncpa [#allocation4], 1 }

</bundles_post_ra>
